<compile_context>
chip_gen: v5e
topology: v5e:2x2
jax: 0.10.0
libtpu: 0.0.40
codegen_flags: <defaults>
</compile_context>

<pallas_src>
import jax
import jax.numpy as jnp
from jax.experimental import pallas as pl
from jax.experimental.pallas import tpu as pltpu


# ----------------------------------------------------------------------------
# Fused single-invocation multi-layer LSTM-step kernel (no grid)
# ----------------------------------------------------------------------------
def _lstm_step_kernel(rx_ref, h0_ref, c0_ref, w_rx_ref, w_ih_ref, w_hh_ref,
                      b_ref, hn_ref, cn_ref, out_ref):
    """Runs the whole L-layer LSTM step in one kernel invocation.

    rx_ref:   (B, r_dim + x_dim)   pre-packed [r | x] layer-0 input (f32)
    h0_ref:   (L, B, H)            previous hidden state (f32)
    c0_ref:   (L, B, H)            previous cell state   (f32)
    w_rx_ref: (r_dim + x_dim, 4H)  layer-0 W_ih^T                  (bf16)
    w_ih_ref: (max(L-1,1), H, 4H)  W_ih^T for layers 1..L-1        (bf16)
    w_hh_ref: (L, H, 4H)           W_hh^T                          (bf16)
    b_ref:    (L, 1, 4H)           b_ih + b_hh                     (f32)
    hn_ref / cn_ref: (L, B, H)     new state (HBM-aliased with h0/c0)
    out_ref:  (1, B, H)            last layer's hidden output
    """
    L, B, H = hn_ref.shape

    # Layer-0 MXU operand: one fused [r | x] @ W_rx matmul.
    inp = rx_ref[...].astype(jnp.bfloat16)

    h_new = None
    # Statically unrolled layer recurrence (L is tiny). All weights are VMEM
    # resident, so there is no per-layer grid-step overhead and the
    # inter-layer activation never leaves vregs/VMEM.
    for l in range(L):
        h = h0_ref[l].astype(jnp.float32)                     # (B, H)
        c = c0_ref[l].astype(jnp.float32)                     # (B, H)
        w_in = w_rx_ref[...] if l == 0 else w_ih_ref[l - 1]

        # bf16 MXU operands, f32 accumulation, f32 bias add / gate math.
        gates = (jnp.dot(inp, w_in, preferred_element_type=jnp.float32)
                 + jnp.dot(h.astype(jnp.bfloat16), w_hh_ref[l],
                           preferred_element_type=jnp.float32)
                 + b_ref[l])                                  # (B, 4H)

        # PyTorch gate order i, f, g, o. Compact (unpadded) gate layout:
        # for H < 128 the per-gate 128-lane padding only inflates traffic.
        i_g = jax.nn.sigmoid(gates[:, 0 * H:1 * H])
        f_g = jax.nn.sigmoid(gates[:, 1 * H:2 * H])
        g_g = jnp.tanh(gates[:, 2 * H:3 * H])
        o_g = jax.nn.sigmoid(gates[:, 3 * H:4 * H])

        c_new = f_g * c + i_g * g_g
        h_new = o_g * jnp.tanh(c_new)

        hn_ref[l] = h_new.astype(hn_ref.dtype)
        cn_ref[l] = c_new.astype(cn_ref.dtype)
        inp = h_new.astype(jnp.bfloat16)                      # next layer input

    out_ref[0] = h_new.astype(out_ref.dtype)


# ----------------------------------------------------------------------------
# Parameter preparation
# ----------------------------------------------------------------------------
def init_lstm_params(key, input_dim, hidden, num_layers):
    """Torch-layout synthetic params mirroring Controller.reset_parameters:
    xavier_uniform on 2-D weights, zeros on 1-D biases."""
    params = []
    for layer in range(num_layers):
        in_dim = input_dim if layer == 0 else hidden
        key, k1, k2 = jax.random.split(key, 3)

        def xavier(k, shape):
            fan_out, fan_in = shape
            bound = (6.0 / (fan_in + fan_out)) ** 0.5
            return jax.random.uniform(k, shape, jnp.float32, -bound, bound)

        params.append(dict(
            w_ih=xavier(k1, (4 * hidden, in_dim)),    # torch layout (4H, D_in)
            w_hh=xavier(k2, (4 * hidden, hidden)),    # torch layout (4H, H)
            b_ih=jnp.zeros((4 * hidden,), jnp.float32),
            b_hh=jnp.zeros((4 * hidden,), jnp.float32),
        ))
    return params


def prepare_kernel_params(params, hidden, weights_dtype=jnp.bfloat16):
    """Stack per-layer params into kernel-ready arrays.

    Weights are bf16 (MXU-native); bias stays f32. No per-gate padding
    (compact (D, 4H) layout) and no zero W_ih[0] slot.
    """
    H = hidden
    L = len(params)

    w_rx = params[0]["w_ih"].T.astype(weights_dtype)          # (r+x, 4H)
    if L > 1:
        w_ih = jnp.stack(
            [params[l]["w_ih"].T for l in range(1, L)]).astype(weights_dtype)
    else:
        # Dummy, never read (static layer loop skips it when L == 1).
        w_ih = jnp.zeros((1, H, 4 * H), weights_dtype)
    w_hh = jnp.stack(
        [params[l]["w_hh"].T for l in range(L)]).astype(weights_dtype)
    b = jnp.stack(
        [(params[l]["b_ih"] + params[l]["b_hh"]).reshape(1, 4 * H)
         for l in range(L)]).astype(jnp.float32)              # (L, 1, 4H)

    return dict(w_rx=w_rx, w_ih=w_ih, w_hh=w_hh, b=b)


# ----------------------------------------------------------------------------
# Forward pass (single fused pallas_call, no grid)
# ----------------------------------------------------------------------------
def lstm_controller_forward(x, r, lstm_h, lstm_c, kparams):
    """Equivalent of LSTMController.forward(x, r, lstm_h, lstm_c)."""
    L, B, H = lstm_h.shape
    # One-off tiny XLA concat lets layer 0 run a single fused matmul.
    rx = jnp.concatenate([r, x[0]], axis=1)                   # (B, r_dim+x_dim)

    vmem = pl.BlockSpec(memory_space=pltpu.MemorySpace.VMEM)
    h_n, c_n, output = pl.pallas_call(
        _lstm_step_kernel,
        out_shape=(jax.ShapeDtypeStruct((L, B, H), lstm_h.dtype),
                   jax.ShapeDtypeStruct((L, B, H), lstm_c.dtype),
                   jax.ShapeDtypeStruct((1, B, H), lstm_h.dtype)),
        in_specs=[vmem] * 7,
        out_specs=(vmem, vmem, vmem),
        # lstm_h -> h_n, lstm_c -> c_n: in-place state update. Pair with
        # caller-side donation (jax.jit(..., donate_argnums=(2, 3))) so XLA
        # does not insert defensive copies each NTM timestep.
        input_output_aliases={1: 0, 2: 1},
    )(rx, lstm_h, lstm_c,
      kparams["w_rx"], kparams["w_ih"], kparams["w_hh"], kparams["b"])

    return output, (h_n, c_n)


# ----------------------------------------------------------------------------
# Pure-JAX f32 reference (PyTorch nn.LSTM semantics) for verification
# ----------------------------------------------------------------------------
def lstm_reference(x, r, lstm_h, lstm_c, params):
    hi_p = jax.lax.Precision.HIGHEST
    xt = jnp.concatenate([r, x[0]], axis=1)
    L, _, H = lstm_h.shape
    h_list, c_list = [], []
    inp = xt
    for l in range(L):
        p = params[l]
        gates = (jnp.dot(inp, p["w_ih"].T, precision=hi_p)
                 + jnp.dot(lstm_h[l], p["w_hh"].T, precision=hi_p)
                 + p["b_ih"] + p["b_hh"])
        i_g = jax.nn.sigmoid(gates[:, 0 * H:1 * H])
        f_g = jax.nn.sigmoid(gates[:, 1 * H:2 * H])
        g_g = jnp.tanh(gates[:, 2 * H:3 * H])
        o_g = jax.nn.sigmoid(gates[:, 3 * H:4 * H])
        c_new = f_g * lstm_c[l] + i_g * g_g
        h_new = o_g * jnp.tanh(c_new)
        h_list.append(h_new)
        c_list.append(c_new)
        inp = h_new
    return inp[None], (jnp.stack(h_list), jnp.stack(c_list))


if __name__ == "__main__":
    key = jax.random.PRNGKey(0)
    B, x_dim, r_dim, H, L = 2, 16, 16, 32, 2
    input_dim = r_dim + x_dim   # LSTM input_size = concat(r, x) feature width

    k_x, k_r, k_hb, k_cb, k_p = jax.random.split(key, 5)
    x = jax.random.normal(k_x, (1, B, x_dim), jnp.float32)
    r = jax.random.normal(k_r, (B, r_dim), jnp.float32)

    # create_state(batch_size): learned per-layer biases repeated over batch
    lstm_h_bias = jax.random.normal(k_hb, (L, 1, H), jnp.float32) * 0.05
    lstm_c_bias = jax.random.normal(k_cb, (L, 1, H), jnp.float32) * 0.05
    lstm_h = jnp.tile(lstm_h_bias, (1, B, 1))
    lstm_c = jnp.tile(lstm_c_bias, (1, B, 1))

    params = init_lstm_params(k_p, input_dim, H, L)
    kparams = prepare_kernel_params(params, H)

    # Compute the f32 reference BEFORE the kernel call: lstm_h / lstm_c are
    # donated to (and consumed by) the fused kernel.
    out_ref, (h_ref, c_ref) = lstm_reference(x, r, lstm_h, lstm_c, params)

    forward = jax.jit(lstm_controller_forward, donate_argnums=(2, 3))
    output, (h_n, c_n) = forward(x, r, lstm_h, lstm_c, kparams)
    jax.block_until_ready((output, h_n, c_n))

    assert output.shape == (1, B, H)
    assert h_n.shape == (L, B, H) and c_n.shape == (L, B, H)

    # bf16 weights / MXU operands (f32 accumulation) => relaxed tolerance vs
    # the f32 HIGHEST-precision reference.
    assert bool(jnp.allclose(output, out_ref, atol=2e-2, rtol=2e-2))
    assert bool(jnp.allclose(h_n, h_ref, atol=2e-2, rtol=2e-2))
    assert bool(jnp.allclose(c_n, c_ref, atol=2e-2, rtol=2e-2))

    print("KERNEL_OK")
</pallas_src>

<mosaic_0001>
module attributes {stable_mosaic.version = 11 : i64} {
  func.func @_lstm_step_kernel(%arg0: memref<2x32xf32, #tpu.memory_space<vmem>>, %arg1: memref<2x2x32xf32, #tpu.memory_space<vmem>>, %arg2: memref<2x2x32xf32, #tpu.memory_space<vmem>>, %arg3: memref<32x128xbf16, #tpu.memory_space<vmem>>, %arg4: memref<1x32x128xbf16, #tpu.memory_space<vmem>>, %arg5: memref<2x32x128xbf16, #tpu.memory_space<vmem>>, %arg6: memref<2x1x128xf32, #tpu.memory_space<vmem>>, %arg7: memref<2x2x32xf32, #tpu.memory_space<vmem>>, %arg8: memref<2x2x32xf32, #tpu.memory_space<vmem>>, %arg9: memref<1x2x32xf32, #tpu.memory_space<vmem>>) attributes {dimension_semantics = [], scalar_prefetch = 0 : i64, scratch_operands = 0 : i64, tpu.core_type = #tpu.core_type<tc>} {
    %c0 = arith.constant 0 : index
    %c0_0 = arith.constant 0 : index
    %0 = vector.load %arg0[%c0, %c0_0] : memref<2x32xf32, #tpu.memory_space<vmem>>, vector<2x32xf32>
    %1 = arith.truncf %0 : vector<2x32xf32> to vector<2x32xbf16>
    %c0_1 = arith.constant 0 : index
    %c0_2 = arith.constant 0 : index
    %c0_3 = arith.constant 0 : index
    %2 = vector.load %arg1[%c0_1, %c0_2, %c0_3] : memref<2x2x32xf32, #tpu.memory_space<vmem>>, vector<1x2x32xf32>
    %3 = vector.shape_cast %2 : vector<1x2x32xf32> to vector<2x32xf32>
    %c0_4 = arith.constant 0 : index
    %c0_5 = arith.constant 0 : index
    %c0_6 = arith.constant 0 : index
    %4 = vector.load %arg2[%c0_4, %c0_5, %c0_6] : memref<2x2x32xf32, #tpu.memory_space<vmem>>, vector<1x2x32xf32>
    %5 = vector.shape_cast %4 : vector<1x2x32xf32> to vector<2x32xf32>
    %c0_7 = arith.constant 0 : index
    %c0_8 = arith.constant 0 : index
    %6 = vector.load %arg3[%c0_7, %c0_8] : memref<32x128xbf16, #tpu.memory_space<vmem>>, vector<32x128xbf16>
    %cst = arith.constant dense<0.000000e+00> : vector<2x128xf32>
    %7 = tpu.matmul %1, %6, %cst {dimension_numbers = #tpu.dot_dimension_numbers<[1], [0], [0], [1], [0, 0, 1, 1], [], []>} : vector<2x32xbf16>, vector<32x128xbf16>, vector<2x128xf32> -> vector<2x128xf32>
    %8 = arith.truncf %3 : vector<2x32xf32> to vector<2x32xbf16>
    %c0_9 = arith.constant 0 : index
    %c0_10 = arith.constant 0 : index
    %c0_11 = arith.constant 0 : index
    %9 = vector.load %arg5[%c0_9, %c0_10, %c0_11] : memref<2x32x128xbf16, #tpu.memory_space<vmem>>, vector<1x32x128xbf16>
    %10 = vector.shape_cast %9 : vector<1x32x128xbf16> to vector<32x128xbf16>
    %cst_12 = arith.constant dense<0.000000e+00> : vector<2x128xf32>
    %11 = tpu.matmul %8, %10, %cst_12 {dimension_numbers = #tpu.dot_dimension_numbers<[1], [0], [0], [1], [0, 0, 1, 1], [], []>} : vector<2x32xbf16>, vector<32x128xbf16>, vector<2x128xf32> -> vector<2x128xf32>
    %12 = arith.addf %7, %11 : vector<2x128xf32>
    %c0_13 = arith.constant 0 : index
    %c0_14 = arith.constant 0 : index
    %c0_15 = arith.constant 0 : index
    %13 = vector.load %arg6[%c0_13, %c0_14, %c0_15] : memref<2x1x128xf32, #tpu.memory_space<vmem>>, vector<1x1x128xf32>
    %14 = vector.shape_cast %13 : vector<1x1x128xf32> to vector<1x128xf32>
    %15 = vector.broadcast %14 : vector<1x128xf32> to vector<2x128xf32>
    %16 = arith.addf %12, %15 : vector<2x128xf32>
    %17 = vector.extract_strided_slice %16 {offsets = [0, 0], sizes = [2, 32], strides = [1, 1]} : vector<2x128xf32> to vector<2x32xf32>
    %18 = arith.negf %17 : vector<2x32xf32>
    %19 = math.exp %18 : vector<2x32xf32>
    %cst_16 = arith.constant 1.000000e+00 : f32
    %20 = vector.broadcast %cst_16 : f32 to vector<2x32xf32>
    %21 = arith.addf %20, %19 : vector<2x32xf32>
    %22 = arith.divf %20, %21 : vector<2x32xf32>
    %23 = vector.extract_strided_slice %16 {offsets = [0, 32], sizes = [2, 32], strides = [1, 1]} : vector<2x128xf32> to vector<2x32xf32>
    %24 = arith.negf %23 : vector<2x32xf32>
    %25 = math.exp %24 : vector<2x32xf32>
    %cst_17 = arith.constant 1.000000e+00 : f32
    %26 = vector.broadcast %cst_17 : f32 to vector<2x32xf32>
    %27 = arith.addf %26, %25 : vector<2x32xf32>
    %28 = arith.divf %26, %27 : vector<2x32xf32>
    %29 = vector.extract_strided_slice %16 {offsets = [0, 64], sizes = [2, 32], strides = [1, 1]} : vector<2x128xf32> to vector<2x32xf32>
    %30 = math.tanh %29 : vector<2x32xf32>
    %31 = vector.extract_strided_slice %16 {offsets = [0, 96], sizes = [2, 32], strides = [1, 1]} : vector<2x128xf32> to vector<2x32xf32>
    %32 = arith.negf %31 : vector<2x32xf32>
    %33 = math.exp %32 : vector<2x32xf32>
    %cst_18 = arith.constant 1.000000e+00 : f32
    %34 = vector.broadcast %cst_18 : f32 to vector<2x32xf32>
    %35 = arith.addf %34, %33 : vector<2x32xf32>
    %36 = arith.divf %34, %35 : vector<2x32xf32>
    %37 = arith.mulf %28, %5 : vector<2x32xf32>
    %38 = arith.mulf %22, %30 : vector<2x32xf32>
    %39 = arith.addf %37, %38 : vector<2x32xf32>
    %40 = math.tanh %39 : vector<2x32xf32>
    %41 = arith.mulf %36, %40 : vector<2x32xf32>
    %c0_19 = arith.constant 0 : index
    %c0_20 = arith.constant 0 : index
    %c0_21 = arith.constant 0 : index
    %42 = vector.load %arg7[%c0_19, %c0_20, %c0_21] : memref<2x2x32xf32, #tpu.memory_space<vmem>>, vector<1x2x32xf32>
    %43 = vector.shape_cast %42 : vector<1x2x32xf32> to vector<2x32xf32>
    %44 = vector.shape_cast %41 : vector<2x32xf32> to vector<1x2x32xf32>
    tpu.vector_store %arg7[%c0_19, %c0_20, %c0_21], %44 {strides = array<i32>} : memref<2x2x32xf32, #tpu.memory_space<vmem>>, vector<1x2x32xf32>,
    %c0_22 = arith.constant 0 : index
    %c0_23 = arith.constant 0 : index
    %c0_24 = arith.constant 0 : index
    %45 = vector.load %arg8[%c0_22, %c0_23, %c0_24] : memref<2x2x32xf32, #tpu.memory_space<vmem>>, vector<1x2x32xf32>
    %46 = vector.shape_cast %45 : vector<1x2x32xf32> to vector<2x32xf32>
    %47 = vector.shape_cast %39 : vector<2x32xf32> to vector<1x2x32xf32>
    tpu.vector_store %arg8[%c0_22, %c0_23, %c0_24], %47 {strides = array<i32>} : memref<2x2x32xf32, #tpu.memory_space<vmem>>, vector<1x2x32xf32>,
    %48 = arith.truncf %41 : vector<2x32xf32> to vector<2x32xbf16>
    %c1 = arith.constant 1 : index
    %c0_25 = arith.constant 0 : index
    %c0_26 = arith.constant 0 : index
    %49 = vector.load %arg1[%c1, %c0_25, %c0_26] : memref<2x2x32xf32, #tpu.memory_space<vmem>>, vector<1x2x32xf32>
    %50 = vector.shape_cast %49 : vector<1x2x32xf32> to vector<2x32xf32>
    %c1_27 = arith.constant 1 : index
    %c0_28 = arith.constant 0 : index
    %c0_29 = arith.constant 0 : index
    %51 = vector.load %arg2[%c1_27, %c0_28, %c0_29] : memref<2x2x32xf32, #tpu.memory_space<vmem>>, vector<1x2x32xf32>
    %52 = vector.shape_cast %51 : vector<1x2x32xf32> to vector<2x32xf32>
    %c0_30 = arith.constant 0 : index
    %c0_31 = arith.constant 0 : index
    %c0_32 = arith.constant 0 : index
    %53 = vector.load %arg4[%c0_30, %c0_31, %c0_32] : memref<1x32x128xbf16, #tpu.memory_space<vmem>>, vector<1x32x128xbf16>
    %54 = vector.shape_cast %53 : vector<1x32x128xbf16> to vector<32x128xbf16>
    %cst_33 = arith.constant dense<0.000000e+00> : vector<2x128xf32>
    %55 = tpu.matmul %48, %54, %cst_33 {dimension_numbers = #tpu.dot_dimension_numbers<[1], [0], [0], [1], [0, 0, 1, 1], [], []>} : vector<2x32xbf16>, vector<32x128xbf16>, vector<2x128xf32> -> vector<2x128xf32>
    %56 = arith.truncf %50 : vector<2x32xf32> to vector<2x32xbf16>
    %c1_34 = arith.constant 1 : index
    %c0_35 = arith.constant 0 : index
    %c0_36 = arith.constant 0 : index
    %57 = vector.load %arg5[%c1_34, %c0_35, %c0_36] : memref<2x32x128xbf16, #tpu.memory_space<vmem>>, vector<1x32x128xbf16>
    %58 = vector.shape_cast %57 : vector<1x32x128xbf16> to vector<32x128xbf16>
    %cst_37 = arith.constant dense<0.000000e+00> : vector<2x128xf32>
    %59 = tpu.matmul %56, %58, %cst_37 {dimension_numbers = #tpu.dot_dimension_numbers<[1], [0], [0], [1], [0, 0, 1, 1], [], []>} : vector<2x32xbf16>, vector<32x128xbf16>, vector<2x128xf32> -> vector<2x128xf32>
    %60 = arith.addf %55, %59 : vector<2x128xf32>
    %c1_38 = arith.constant 1 : index
    %c0_39 = arith.constant 0 : index
    %c0_40 = arith.constant 0 : index
    %61 = vector.load %arg6[%c1_38, %c0_39, %c0_40] : memref<2x1x128xf32, #tpu.memory_space<vmem>>, vector<1x1x128xf32>
    %62 = vector.shape_cast %61 : vector<1x1x128xf32> to vector<1x128xf32>
    %63 = vector.broadcast %62 : vector<1x128xf32> to vector<2x128xf32>
    %64 = arith.addf %60, %63 : vector<2x128xf32>
    %65 = vector.extract_strided_slice %64 {offsets = [0, 0], sizes = [2, 32], strides = [1, 1]} : vector<2x128xf32> to vector<2x32xf32>
    %66 = arith.negf %65 : vector<2x32xf32>
    %67 = math.exp %66 : vector<2x32xf32>
    %cst_41 = arith.constant 1.000000e+00 : f32
    %68 = vector.broadcast %cst_41 : f32 to vector<2x32xf32>
    %69 = arith.addf %68, %67 : vector<2x32xf32>
    %70 = arith.divf %68, %69 : vector<2x32xf32>
    %71 = vector.extract_strided_slice %64 {offsets = [0, 32], sizes = [2, 32], strides = [1, 1]} : vector<2x128xf32> to vector<2x32xf32>
    %72 = arith.negf %71 : vector<2x32xf32>
    %73 = math.exp %72 : vector<2x32xf32>
    %cst_42 = arith.constant 1.000000e+00 : f32
    %74 = vector.broadcast %cst_42 : f32 to vector<2x32xf32>
    %75 = arith.addf %74, %73 : vector<2x32xf32>
    %76 = arith.divf %74, %75 : vector<2x32xf32>
    %77 = vector.extract_strided_slice %64 {offsets = [0, 64], sizes = [2, 32], strides = [1, 1]} : vector<2x128xf32> to vector<2x32xf32>
    %78 = math.tanh %77 : vector<2x32xf32>
    %79 = vector.extract_strided_slice %64 {offsets = [0, 96], sizes = [2, 32], strides = [1, 1]} : vector<2x128xf32> to vector<2x32xf32>
    %80 = arith.negf %79 : vector<2x32xf32>
    %81 = math.exp %80 : vector<2x32xf32>
    %cst_43 = arith.constant 1.000000e+00 : f32
    %82 = vector.broadcast %cst_43 : f32 to vector<2x32xf32>
    %83 = arith.addf %82, %81 : vector<2x32xf32>
    %84 = arith.divf %82, %83 : vector<2x32xf32>
    %85 = arith.mulf %76, %52 : vector<2x32xf32>
    %86 = arith.mulf %70, %78 : vector<2x32xf32>
    %87 = arith.addf %85, %86 : vector<2x32xf32>
    %88 = math.tanh %87 : vector<2x32xf32>
    %89 = arith.mulf %84, %88 : vector<2x32xf32>
    %c1_44 = arith.constant 1 : index
    %c0_45 = arith.constant 0 : index
    %c0_46 = arith.constant 0 : index
    %90 = vector.load %arg7[%c1_44, %c0_45, %c0_46] : memref<2x2x32xf32, #tpu.memory_space<vmem>>, vector<1x2x32xf32>
    %91 = vector.shape_cast %90 : vector<1x2x32xf32> to vector<2x32xf32>
    %92 = vector.shape_cast %89 : vector<2x32xf32> to vector<1x2x32xf32>
    tpu.vector_store %arg7[%c1_44, %c0_45, %c0_46], %92 {strides = array<i32>} : memref<2x2x32xf32, #tpu.memory_space<vmem>>, vector<1x2x32xf32>,
    %c1_47 = arith.constant 1 : index
    %c0_48 = arith.constant 0 : index
    %c0_49 = arith.constant 0 : index
    %93 = vector.load %arg8[%c1_47, %c0_48, %c0_49] : memref<2x2x32xf32, #tpu.memory_space<vmem>>, vector<1x2x32xf32>
    %94 = vector.shape_cast %93 : vector<1x2x32xf32> to vector<2x32xf32>
    %95 = vector.shape_cast %87 : vector<2x32xf32> to vector<1x2x32xf32>
    tpu.vector_store %arg8[%c1_47, %c0_48, %c0_49], %95 {strides = array<i32>} : memref<2x2x32xf32, #tpu.memory_space<vmem>>, vector<1x2x32xf32>,
    %c0_50 = arith.constant 0 : index
    %c0_51 = arith.constant 0 : index
    %c0_52 = arith.constant 0 : index
    %96 = vector.load %arg9[%c0_50, %c0_51, %c0_52] : memref<1x2x32xf32, #tpu.memory_space<vmem>>, vector<1x2x32xf32>
    %97 = vector.shape_cast %96 : vector<1x2x32xf32> to vector<2x32xf32>
    %98 = vector.shape_cast %89 : vector<2x32xf32> to vector<1x2x32xf32>
    tpu.vector_store %arg9[%c0_50, %c0_51, %c0_52], %98 {strides = array<i32>} : memref<1x2x32xf32, #tpu.memory_space<vmem>>, vector<1x2x32xf32>,
    return
  }
}

</mosaic_0001>

<bundles_post_ra>
// kernel: lstm_controller_forward.1
= control target key start
LH: loop header
LB: loop body
LE: loop exit
PB: predicated region body
PF: predicated region fallthrough
CT: control target
= control target key end

     0   :  { %15 = vsyncpa [#allocation3], 0  ;;  %s677_s0 = inlined_call_operand.vmem [shape: f32[2,32], index: 0, kind: input, shape index: {}]   ;;  %s678_s1 = inlined_call_operand.vmem [shape: f32[2,2,32], index: 1, kind: input, shape index: {}, may-alias: {1,7}]   ;;  %s679_s2 = inlined_call_operand.vmem [shape: f32[2,2,32], index: 2, kind: input, shape index: {}, may-alias: {2,8}]   ;;  %s680_s3 = inlined_call_operand.hbm [shape: bf16[32,128], index: 3, kind: input, shape index: {}]   ;;  %s681_s4 = inlined_call_operand.hbm [shape: bf16[1,32,128], index: 4, kind: input, shape index: {}]   ;;  %s682_s5 = inlined_call_operand.hbm [shape: bf16[2,32,128], index: 5, kind: input, shape index: {}]   ;;  %s683_s6 = inlined_call_operand.vmem [shape: f32[2,1,128], index: 6, kind: input, shape index: {}]   ;;  %s684_s7 = inlined_call_operand.vmem [shape: f32[2,2,32], index: 7, kind: output, shape index: {0}, may-alias: {1,7}]   ;;  %s685_s8 = inlined_call_operand.vmem [shape: f32[2,2,32], index: 8, kind: output, shape index: {1}, may-alias: {2,8}]   ;;  %s686_s9 = inlined_call_operand.hbm [shape: f32[1,2,32], index: 9, kind: output, shape index: {2}]  }
   0x1   :  { %16 = vsyncpa [#allocation6], 0 }
   0x2   :  { %17 = vsyncpa [#allocation4], 0  ;;  %s41_s11 = sshll.u32 %s681_s4, 4  ;;  %s544_s12 = smov [#allocation5]   ;;  %s42_s11 = int_to_ptr.hbm [resolvable:$true] %s41_s11 }
   0x3   :  { %s43_s13 = sshll.u32 %s544_s12, 4  ;;  %s28_s16 = sshll.u32 %s680_s3, 4  ;;  %s44_s13 = int_to_ptr.vmem [resolvable:$true] %s43_s13  ;;  %s29_s16 = int_to_ptr.hbm [resolvable:$true] %s28_s16 }
   0x4   :  { %s545_s17 = smov 64   ;;  %s546_s18 = smov 4  }
   0x5   :  { %49 = dma.hbm_to_vmem [thread:$0]  %s42_s11, 256, %s44_s13, [#allocation6], %s545_s17, %s545_s17, %s546_s18  }
   0x6   :  { %s547_s19 = smov [#allocation2]   ;;  %s54_s4 = sshll.u32 %s682_s5, 4  ;;  %s55_s4 = int_to_ptr.hbm [resolvable:$true] %s54_s4 }
   0x7   :  { %s30_s20 = sshll.u32 %s547_s19, 4  ;;  %s548_s23 = smov [#allocation7]   ;;  %s31_s20 = int_to_ptr.vmem [resolvable:$true] %s30_s20 }
   0x8   :  { %36 = dma.hbm_to_vmem [thread:$0]  %s29_s16, 256, %s31_s20, [#allocation3], %s545_s17, %s545_s17, %s546_s18  }
   0x9   :  { %s56_s24 = sshll.u32 %s548_s23, 4  ;;  %s57_s24 = int_to_ptr.vmem [resolvable:$true] %s56_s24 }
   0xa   :  { %62 = dma.hbm_to_vmem [thread:$0]  %s55_s4, 512, %s57_s24, [#allocation6], %s545_s17, %s545_s17, %s546_s18  }
   0xb   :  { %538 = dma.done.wait [#allocation3], 256  }
   0xc   :  { %539 = vsyncadd [#allocation3], 4294967040 }
   0xd   :  { %540 = dma.done.wait [#allocation6], 768  }
   0xe   :  { %541 = vsyncadd [#allocation6], 4294966528  ;;  %v411_v0 = vld [vmem:[#allocation7 + $0x8] sm:$0xff]  ;;  %v410_v2 = vld [vmem:[#allocation7] sm:$0xff]  ;;  %vm103_vm0 = vcmask 261120   ;;  %s549_s30 = smov 32  }
   0xf   :  { %v409_v1 = vld [vmem:[#allocation2 + $0x8] sm:$0xff]  ;;  %v408_v3 = vld [vmem:[#allocation2] sm:$0xff]  ;;  %113 = vmatpush.bf16.msra.mxu0 %v411_v0  ;;  %v415_v37 = vld [vmem:[#allocation7 + $0x18] sm:$0xff]  ;;  %vm198_vm9 = vcmask 254976   ;;  %s550_s15 = smov 96   ;;  %s551_s19 = smov [#allocation8]  }
  0x10   :  { %v80_v4 = vld [vmem:[%s678_s1] sm:$0x3]  ;;  %141 = vmatpush.bf16.msra.mxu1 %v409_v1  ;;  %v413_v38 = vld [vmem:[#allocation5 + $0x8] sm:$0xff]  ;;  %241 = vmatpush.bf16.msra.mxu2 %v415_v37  ;;  %v414_v39 = vld [vmem:[#allocation7 + $0x10] sm:$0xff]  ;;  %s348_s20 = sshll.u32 %s551_s19, 4  ;;  %s349_s20 = int_to_ptr.vmem [resolvable:$true] %s348_s20 }
  0x11   :  { %v78_v5 = vld [vmem:[%s677_s0] sm:$0x3]  ;;  %v86_v6 = vpack.c.bf16 %v80_v4, %v80_v4  ;;  %v384_v40 = vld [vmem:[%s678_s1 + $0x2] sm:$0x3]  ;;  %272 = vmatpush.bf16.msra.mxu3 %v413_v38  ;;  %v412_v41 = vld [vmem:[#allocation5] sm:$0xff] }
  0x12   :  { %v79_v7 = vpack.c.bf16 %v78_v5, %v78_v5  ;;  %v424_v8 = vld [vmem:[%s683_s6] ss:$0 sm:$0xff]  ;;  %v214_v42 = vpack.c.bf16 %v384_v40, %v384_v40  ;;  %v385_v46 = vld [vmem:[%s679_s2 + $0x2] sm:$0x3]  ;;  %v425_v50 = vld [vmem:[%s683_s6 + $0x1] ss:$0 sm:$0xff] }
  0x13   :  { %114 = vmatpush.bf16.msra.mxu0 %v410_v2  ;;  %v81_v16 = vld [vmem:[%s679_s2] sm:$0x3] }
  0x14   :  { %142 = vmatpush.bf16.msra.mxu1 %v408_v3  ;;  %242 = vmatpush.bf16.msra.mxu2 %v414_v39 }
  0x15   :  { %273 = vmatpush.bf16.msra.mxu3 %v412_v41 }
  0x16   :  { %373 = vmatmul.msk.bf16.vlgmr.msra.gmra.mxu0 %vm103_vm0, %v86_v6 }
  0x17   :  { %382 = vmatmul.msk.bf16.vlgmr.msra.gmra.mxu1 %vm103_vm0, %v79_v7  ;;  %394 = vmatmul.msk.bf16.vlgmr.msra.gmra.mxu2 %vm103_vm0, %v214_v42 }
  0x93   :  { %v116_v9 = vpop.f32.mrf.mxu0 }
  0x94   :  { %v144_v10 = vpop.f32.mrf.mxu1 }
  0x95   :  { %v145_v11 = vadd.f32 %v144_v10, %v116_v9 }
  0x97   :  { %v152_v12 = vadd.f32 %v424_v8, %v145_v11 }
  0x99   :  { %426 = vtanh.f32 %v152_v12  ;;  %v383_v17 = vmul.f32 -1.442695, %v152_v12 }
  0x9a   :  { %v244_v48 = vpop.f32.mrf.mxu2 }
  0x9b   :  { %v118_v13 = vpop.f32.mrf.mxu0  ;;  %428 = vpow2.f32 %v383_v17 }
  0x9c   :  { %v146_v14 = vpop.f32.mrf.mxu1 }
  0x9f   :  { %v427_v15 = vpop.eup %426 }
  0xa0   :  { %179 = vrot.lane.b32.xlu0 %v427_v15, %s545_s17 }
  0xa1   :  { %v429_v18 = vpop.eup %428 }
  0xa2   :  { %v156_v19 = vadd.f32 1.0, %v429_v18  ;;  %v246_v49 = vpop.f32.mrf.mxu2 }
  0xa4   :  { %430 = vrcp.f32 %v156_v19  ;;  %v168_v25 = vand.u32 2147483648, %v156_v19  ;;  %vm162_vm2 = vweird.f32 %v156_v19  ;;  %v166_v26 = vand.u32 2147483647, %v156_v19 }
  0xa6   :  { %v169_v28 = vor.u32 1.1754944e-38, %v168_v25  ;;  %vm167_vm4 = vcmp.eq.f32.partialorder %v166_v26, 8.507059e+37 }
  0xa8   :  { %174 = vrot.lane.b32.xlu0 %v81_v16, %s549_s30 }
  0xaa   :  { %v431_v20 = vpop.eup %430 }
  0xab   :  { %v158_v21 = vmul.f32 %v431_v20, %v156_v19  ;;  %vm163_vm1 = vweird.f32 %v431_v20 }
  0xac   :  { %vm164_vm3 = vmor %vm162_vm2, %vm163_vm1 }
  0xad   :  { %v159_v22 = vsub.f32 1.0, %v158_v21 }
  0xaf   :  { %v160_v23 = vmul.f32 %v431_v20, %v159_v22 }
  0xb0   :  { %306 = vrot.lane.b32.xlu0 %v385_v46, %s549_s30 }
  0xb1   :  { %v161_v24 = vadd.f32 %v431_v20, %v160_v23 }
  0xb3   :  { %v165_v27 = vsel %vm164_vm3, %v431_v20, %v161_v24 }
  0xb4   :  { %v170_v30 = vsel %vm167_vm4, %v169_v28, %v165_v27 }
 0x112   :  { %v180_v29 = vpop.permute.xlu0 %179 }
 0x113   :  { %v182_v31 = vmul.f32 %v180_v29, %v170_v30 }
 0x115   :  { %184 = vrot.lane.b32.xlu1 %v182_v31, %s549_s30 }
 0x11a   :  { %v175_v32 = vpop.permute.xlu0 %174 }
 0x11b   :  { %v177_v33 = vmul.f32 %v175_v32, %v170_v30 }
 0x122   :  { %v307_v7 = vpop.permute.xlu0 %306 }
 0x187   :  { %v185_v34 = vpop.permute.xlu1 %184 }
 0x188   :  { %v634_v35 = vadd.f32 %v185_v34, %v177_v33 }
 0x18a   :  { %432 = vtanh.f32 %v634_v35 }
 0x190   :  { %v433_v36 = vpop.eup %432 }
 0x191   :  { %190 = vrot.lane.b32.xlu1 %v433_v36, %s545_s17 }
 0x203   :  { %v191_v43 = vpop.permute.xlu1 %190 }
 0x204   :  { %v193_v44 = vmul.f32 %v191_v43, %v170_v30 }
 0x206   :  { %v205_v45 = vpack.c.bf16 %v193_v44, %v193_v44 }
 0x208   :  { %249 = vrot.lane.b32.xlu2 %v205_v45, %s549_s30 }
 0x262   :  { %v250_v47 = vpop.permute.xlu2 %249 }
 0x263   :  { %403 = vmatmul.msk.bf16.vlgmr.msra.gmra.mxu3 %vm103_vm0, %v250_v47 }
 0x2e6   :  { %v275_v51 = vpop.f32.mrf.mxu3 }
 0x2e7   :  { %v276_v52 = vadd.f32 %v275_v51, %v244_v48 }
 0x2e9   :  { %v284_v53 = vadd.f32 %v425_v50, %v276_v52 }
 0x2eb   :  { %434 = vtanh.f32 %v284_v53  ;;  %v405_v56 = vmul.f32 -1.442695, %v284_v53 }
 0x2ed   :  { %436 = vpow2.f32 %v405_v56 }
 0x2ee   :  { %v277_v54 = vpop.f32.mrf.mxu3 }
 0x2f1   :  { %v435_v55 = vpop.eup %434 }
 0x2f2   :  { %311 = vrot.lane.b32.xlu2 %v435_v55, %s545_s17 }
 0x2f3   :  { %v437_v57 = vpop.eup %436 }
 0x2f4   :  { %v288_v58 = vadd.f32 1.0, %v437_v57 }
 0x2f6   :  { %438 = vrcp.f32 %v288_v58  ;;  %v300_v0 = vand.u32 2147483648, %v288_v58  ;;  %vm294_vm6 = vweird.f32 %v288_v58  ;;  %v298_v1 = vand.u32 2147483647, %v288_v58 }
 0x2f8   :  { %v301_v3 = vor.u32 1.1754944e-38, %v300_v0  ;;  %vm299_vm8 = vcmp.eq.f32.partialorder %v298_v1, 8.507059e+37 }
 0x2fc   :  { %v439_v59 = vpop.eup %438 }
 0x2fd   :  { %v290_v60 = vmul.f32 %v439_v59, %v288_v58  ;;  %vm295_vm5 = vweird.f32 %v439_v59 }
 0x2fe   :  { %vm296_vm7 = vmor %vm294_vm6, %vm295_vm5 }
 0x2ff   :  { %v291_v61 = vsub.f32 1.0, %v290_v60 }
 0x301   :  { %v292_v62 = vmul.f32 %v439_v59, %v291_v61 }
 0x303   :  { %v293_v63 = vadd.f32 %v439_v59, %v292_v62 }
 0x305   :  { %v297_v2 = vsel %vm296_vm7, %v439_v59, %v293_v63 }
 0x306   :  { %v302_v4 = vsel %vm299_vm8, %v301_v3, %v297_v2 }
 0x307   :  { %v309_v8 = vmul.f32 %v307_v7, %v302_v4 }
 0x34c   :  { %v312_v5 = vpop.permute.xlu2 %311 }
 0x34d   :  { %v314_v6 = vmul.f32 %v312_v5, %v302_v4 }
 0x34f   :  { %316 = vrot.lane.b32.xlu1 %v314_v6, %s549_s30 }
 0x357   :  { %195 = vrot.lane.b32.xlu1 %v193_v44, %s549_s30 }
 0x3c1   :  { %v317_v9 = vpop.permute.xlu1 %316 }
 0x3c2   :  { %v319_v10 = vadd.f32 %v317_v9, %v309_v8 }
 0x3c4   :  { %440 = vtanh.f32 %v319_v10 }
 0x3c9   :  { %v196_v11 = vpop.permute.xlu1 %195 }
 0x3ca   :  { %v441_v12 = vpop.eup %440  ;;  %199 = vst.msk [vmem:[%s684_s7] sm:$0x3] %vm198_vm9, %v196_v11 }
 0x3cb   :  { %322 = vrot.lane.b32.xlu2 %v441_v12, %s545_s17  ;;  %s350_s17 = sshll.u32 %s686_s9, 4  ;;  %s351_s17 = int_to_ptr.hbm [resolvable:$true] %s350_s17 }
 0x3d3   :  { %201 = vrot.lane.b32.xlu2 %v634_v35, %s550_s15 }
 0x425   :  { %v323_v13 = vpop.permute.xlu2 %322 }
 0x426   :  { %v325_v14 = vmul.f32 %v323_v13, %v302_v4 }
 0x428   :  { %327 = vrot.lane.b32.xlu0 %v325_v14, %s549_s30 }
 0x42d   :  { %v202_v15 = vpop.permute.xlu2 %201 }
 0x42e   :  { %204 = vst.msk [vmem:[%s685_s8] sm:$0x3] %vm198_vm9, %v202_v15 }
 0x430   :  { %333 = vrot.lane.b32.xlu0 %v319_v10, %s550_s15 }
 0x49a   :  { %v328_v16 = vpop.permute.xlu0 %327 }
 0x49b   :  { %406 = vst.msk [vmem:[%s684_s7 + $0x2] sm:$0x3] %vm198_vm9, %v328_v16 }
 0x49c   :  { %338 = vst.msk [vmem:[#allocation8] sm:$0x3] %vm198_vm9, %v328_v16 }
 0x49d   :  { %353 = dma.vmem_to_hbm [thread:$0]  %s349_s20, 32, %s351_s17, [#allocation4]  }
 0x4a2   :  { %v334_v17 = vpop.permute.xlu0 %333 }
 0x4a3   :  { %407 = vst.msk [vmem:[%s685_s8 + $0x2] sm:$0x3] %vm198_vm9, %v334_v17 }
 0x4a4   :  { %542 = dma.done.wait [#allocation4], 32  }
 0x4a5   :  { %543 = vsyncadd [#allocation4], 4294967264 }
 0x4a6   :  { %362 = vsyncpa [#allocation3], 1 }
 0x4a7   :  { %363 = vsyncpa [#allocation6], 1 }
 0x4a8   :  { %364 = vsyncpa [#allocation4], 1 }

</bundles_post_ra>
